<compile_context>
chip_gen: v6e
topology: v6e:2x2x1
jax: 0.10.0
libtpu: 0.0.40
codegen_flags: <defaults>
</compile_context>

<pallas_src>
import functools

import jax
import jax.numpy as jnp
from jax.experimental import pallas as pl
from jax.experimental.pallas import tpu as pltpu


def _round_up(n, m):
    return ((n + m - 1) // m) * m


def annnet_kernel(x_ref, w1_ref, b1_ref, w2_ref, b2_ref, w3_ref, b3_ref, o_ref):
    # Transposed layout: x_ref is (D_in, tile_b); weights are PyTorch (out, in);
    # biases are (out, 1) columns; output block is (D_out, tile_b).
    mm_dtype = x_ref.dtype                      # matmul input dtype (f32 or bf16)

    x = x_ref[...]
    h = jnp.dot(w1_ref[...], x, preferred_element_type=jnp.float32) + b1_ref[...]
    h = jnp.maximum(h, 0.0).astype(mm_dtype)    # relu1 (VPU)

    h = jnp.dot(w2_ref[...], h, preferred_element_type=jnp.float32) + b2_ref[...]
    h = jnp.maximum(h, 0.0).astype(mm_dtype)    # relu2 (VPU)

    out = jnp.dot(w3_ref[...], h, preferred_element_type=jnp.float32) + b3_ref[...]
    o_ref[...] = out.astype(o_ref.dtype)


def annnet_forward(x, w1, b1, w2, b2, w3, b3, *, tile_b=1024,
                   matmul_dtype=jnp.float32):
    """x: (B, D_in); weights in PyTorch (out, in) layout; biases (out,)."""
    B, D_in = x.shape
    D_out = w3.shape[0]

    # Lane-dense layout: batch on the 128-lane axis (layout plumbing only).
    xt = x.T.astype(matmul_dtype)                                   # (D_in, B)
    w1c, w2c, w3c = (w.astype(matmul_dtype) for w in (w1, w2, w3))
    b1c, b2c, b3c = (b.reshape(-1, 1).astype(jnp.float32) for b in (b1, b2, b3))

    # Batch-tile selection.
    if B <= 512:
        tile = B                      # single full-extent block (tiny inputs)
    else:
        tile_b = max(128, _round_up(tile_b, 128))
        # Keep >= 2 grid steps so v7x's two TensorCores both get work.
        tile = min(tile_b, _round_up(pl.cdiv(B, 2), 128))
    grid = (pl.cdiv(B, tile),)        # ragged last block handled by Pallas

    def resident(a):
        # Constant block index across the grid => stays resident in VMEM.
        return pl.BlockSpec(a.shape, lambda i, _nd=a.ndim: (0,) * _nd)

    out_t = pl.pallas_call(
        annnet_kernel,
        out_shape=jax.ShapeDtypeStruct((D_out, B), jnp.float32),
        grid=grid,
        in_specs=[
            pl.BlockSpec((D_in, tile), lambda i: (0, i)),   # x^T streams per tile
            resident(w1c), resident(b1c),
            resident(w2c), resident(b2c),
            resident(w3c), resident(b3c),
        ],
        out_specs=pl.BlockSpec((D_out, tile), lambda i: (0, i)),
        compiler_params=pltpu.CompilerParams(
            dimension_semantics=("parallel",),              # megacore on v7x
            vmem_limit_bytes=32 * 1024 * 1024,              # safe on v7x 64 MiB
        ),
    )(xt, w1c, b1c, w2c, b2c, w3c, b3c)

    return out_t.T                                          # back to (B, D_out)


def init_linear_params(key, in_features, out_features):
    # Deterministic init mimicking PyTorch's uniform(-1/sqrt(in), 1/sqrt(in)).
    kw, kb = jax.random.split(key)
    bound = 1.0 / jnp.sqrt(jnp.float32(in_features))
    # PyTorch layout: W (out, in), b (out,).
    w = jax.random.uniform(kw, (out_features, in_features), jnp.float32, -bound, bound)
    b = jax.random.uniform(kb, (out_features,), jnp.float32, -bound, bound)
    return w, b


def reference_forward(x, w1, b1, w2, b2, w3, b3):
    h = jnp.maximum(x @ w1.T + b1, 0.0)
    h = jnp.maximum(h @ w2.T + b2, 0.0)
    return h @ w3.T + b3


if __name__ == "__main__":
    # input_size == output_size == 32 (required by the module's own structure:
    # fc2/fc3 consume fc1's output, so output_size must equal input_size).
    D = 32
    key = jax.random.PRNGKey(0)
    kx, k1, k2, k3, kx2 = jax.random.split(key, 5)

    w1, b1 = init_linear_params(k1, D, D)
    w2, b2 = init_linear_params(k2, D, D)
    w3, b3 = init_linear_params(k3, D, D)

    fwd = jax.jit(functools.partial(annnet_forward, tile_b=1024))

    # 1) Small-batch path: single full-extent block.
    x_small = jax.random.normal(kx, (256, D), jnp.float32)
    out_small = jax.block_until_ready(fwd(x_small, w1, b1, w2, b2, w3, b3))
    ref_small = reference_forward(x_small, w1, b1, w2, b2, w3, b3)
    assert out_small.shape == (256, D), out_small.shape
    assert jnp.allclose(out_small, ref_small, atol=1e-4, rtol=1e-4)

    # 2) Tiled path: >= 2 grid steps and a ragged last block (B=1300, tile=768).
    Bbig = 1300
    x_big = jax.random.normal(kx2, (Bbig, D), jnp.float32)
    out_big = jax.block_until_ready(fwd(x_big, w1, b1, w2, b2, w3, b3))
    ref_big = reference_forward(x_big, w1, b1, w2, b2, w3, b3)
    assert out_big.shape == (Bbig, D), out_big.shape
    assert jnp.allclose(out_big, ref_big, atol=1e-4, rtol=1e-4)

    # 3) bf16 matmul path (v6e/v7x): halves streamed HBM traffic, f32 accum.
    fwd_bf16 = jax.jit(functools.partial(annnet_forward, tile_b=1024,
                                         matmul_dtype=jnp.bfloat16))
    out_bf16 = jax.block_until_ready(fwd_bf16(x_big, w1, b1, w2, b2, w3, b3))
    assert out_bf16.shape == (Bbig, D), out_bf16.shape
    assert jnp.allclose(out_bf16, ref_big, atol=5e-2, rtol=5e-2)

    print("KERNEL_OK")
</pallas_src>

<mosaic_0001>
module attributes {stable_mosaic.version = 11 : i64} {
  func.func @annnet_kernel(%arg0: i32, %arg1: memref<32x256xf32, #tpu.memory_space<vmem>>, %arg2: memref<32x32xf32, #tpu.memory_space<vmem>>, %arg3: memref<32x1xf32, #tpu.memory_space<vmem>>, %arg4: memref<32x32xf32, #tpu.memory_space<vmem>>, %arg5: memref<32x1xf32, #tpu.memory_space<vmem>>, %arg6: memref<32x32xf32, #tpu.memory_space<vmem>>, %arg7: memref<32x1xf32, #tpu.memory_space<vmem>>, %arg8: memref<32x256xf32, #tpu.memory_space<vmem>>) attributes {dimension_semantics = [#tpu.dimension_semantics<parallel>], iteration_bounds = array<i64: 1>, scalar_prefetch = 0 : i64, scratch_operands = 0 : i64, tpu.core_type = #tpu.core_type<tc>, window_params = [{transform_indices = @transform_0, window_bounds = array<i64: 32, 256>}, {pipeline_mode = #tpu.pipeline_mode<synchronous>, transform_indices = @transform_1, window_bounds = array<i64: 32, 32>}, {pipeline_mode = #tpu.pipeline_mode<synchronous>, transform_indices = @transform_2, window_bounds = array<i64: 32, 1>}, {pipeline_mode = #tpu.pipeline_mode<synchronous>, transform_indices = @transform_3, window_bounds = array<i64: 32, 32>}, {pipeline_mode = #tpu.pipeline_mode<synchronous>, transform_indices = @transform_4, window_bounds = array<i64: 32, 1>}, {pipeline_mode = #tpu.pipeline_mode<synchronous>, transform_indices = @transform_5, window_bounds = array<i64: 32, 32>}, {pipeline_mode = #tpu.pipeline_mode<synchronous>, transform_indices = @transform_6, window_bounds = array<i64: 32, 1>}, {transform_indices = @transform_7, window_bounds = array<i64: 32, 256>}]} {
    %c0 = arith.constant 0 : index
    %c0_0 = arith.constant 0 : index
    %0 = vector.load %arg1[%c0, %c0_0] : memref<32x256xf32, #tpu.memory_space<vmem>>, vector<32x256xf32>
    %c0_1 = arith.constant 0 : index
    %c0_2 = arith.constant 0 : index
    %1 = vector.load %arg2[%c0_1, %c0_2] : memref<32x32xf32, #tpu.memory_space<vmem>>, vector<32x32xf32>
    %cst = arith.constant dense<0.000000e+00> : vector<32x256xf32>
    %2 = tpu.matmul %1, %0, %cst {dimension_numbers = #tpu.dot_dimension_numbers<[1], [0], [0], [1], [0, 0, 1, 1], [], []>} : vector<32x32xf32>, vector<32x256xf32>, vector<32x256xf32> -> vector<32x256xf32>
    %c0_3 = arith.constant 0 : index
    %c0_4 = arith.constant 0 : index
    %3 = vector.load %arg3[%c0_3, %c0_4] : memref<32x1xf32, #tpu.memory_space<vmem>>, vector<32x1xf32>
    %4 = vector.broadcast %3 : vector<32x1xf32> to vector<32x256xf32>
    %5 = arith.addf %2, %4 : vector<32x256xf32>
    %cst_5 = arith.constant 0.000000e+00 : f32
    %6 = vector.broadcast %cst_5 : f32 to vector<32x256xf32>
    %7 = arith.maximumf %5, %6 : vector<32x256xf32>
    %c0_6 = arith.constant 0 : index
    %c0_7 = arith.constant 0 : index
    %8 = vector.load %arg4[%c0_6, %c0_7] : memref<32x32xf32, #tpu.memory_space<vmem>>, vector<32x32xf32>
    %cst_8 = arith.constant dense<0.000000e+00> : vector<32x256xf32>
    %9 = tpu.matmul %8, %7, %cst_8 {dimension_numbers = #tpu.dot_dimension_numbers<[1], [0], [0], [1], [0, 0, 1, 1], [], []>} : vector<32x32xf32>, vector<32x256xf32>, vector<32x256xf32> -> vector<32x256xf32>
    %c0_9 = arith.constant 0 : index
    %c0_10 = arith.constant 0 : index
    %10 = vector.load %arg5[%c0_9, %c0_10] : memref<32x1xf32, #tpu.memory_space<vmem>>, vector<32x1xf32>
    %11 = vector.broadcast %10 : vector<32x1xf32> to vector<32x256xf32>
    %12 = arith.addf %9, %11 : vector<32x256xf32>
    %cst_11 = arith.constant 0.000000e+00 : f32
    %13 = vector.broadcast %cst_11 : f32 to vector<32x256xf32>
    %14 = arith.maximumf %12, %13 : vector<32x256xf32>
    %c0_12 = arith.constant 0 : index
    %c0_13 = arith.constant 0 : index
    %15 = vector.load %arg6[%c0_12, %c0_13] : memref<32x32xf32, #tpu.memory_space<vmem>>, vector<32x32xf32>
    %cst_14 = arith.constant dense<0.000000e+00> : vector<32x256xf32>
    %16 = tpu.matmul %15, %14, %cst_14 {dimension_numbers = #tpu.dot_dimension_numbers<[1], [0], [0], [1], [0, 0, 1, 1], [], []>} : vector<32x32xf32>, vector<32x256xf32>, vector<32x256xf32> -> vector<32x256xf32>
    %c0_15 = arith.constant 0 : index
    %c0_16 = arith.constant 0 : index
    %17 = vector.load %arg7[%c0_15, %c0_16] : memref<32x1xf32, #tpu.memory_space<vmem>>, vector<32x1xf32>
    %18 = vector.broadcast %17 : vector<32x1xf32> to vector<32x256xf32>
    %19 = arith.addf %16, %18 : vector<32x256xf32>
    %c0_17 = arith.constant 0 : index
    %c0_18 = arith.constant 0 : index
    %20 = vector.load %arg8[%c0_17, %c0_18] : memref<32x256xf32, #tpu.memory_space<vmem>>, vector<32x256xf32>
    tpu.vector_store %arg8[%c0_17, %c0_18], %19 {strides = array<i32>} : memref<32x256xf32, #tpu.memory_space<vmem>>, vector<32x256xf32>,
    return
  }
  func.func @transform_0(%arg0: i32) -> (i32, i32) {
    %c0_i32 = arith.constant 0 : i32
    %c0_i32_0 = arith.constant 0 : i32
    return %c0_i32, %arg0 : i32, i32
  }
  func.func @transform_1(%arg0: i32) -> (i32, i32) {
    %c0_i32 = arith.constant 0 : i32
    %c0_i32_0 = arith.constant 0 : i32
    %c0_i32_1 = arith.constant 0 : i32
    return %c0_i32, %c0_i32_0 : i32, i32
  }
  func.func @transform_2(%arg0: i32) -> (i32, i32) {
    %c0_i32 = arith.constant 0 : i32
    %c0_i32_0 = arith.constant 0 : i32
    %c0_i32_1 = arith.constant 0 : i32
    return %c0_i32, %c0_i32_0 : i32, i32
  }
  func.func @transform_3(%arg0: i32) -> (i32, i32) {
    %c0_i32 = arith.constant 0 : i32
    %c0_i32_0 = arith.constant 0 : i32
    %c0_i32_1 = arith.constant 0 : i32
    return %c0_i32, %c0_i32_0 : i32, i32
  }
  func.func @transform_4(%arg0: i32) -> (i32, i32) {
    %c0_i32 = arith.constant 0 : i32
    %c0_i32_0 = arith.constant 0 : i32
    %c0_i32_1 = arith.constant 0 : i32
    return %c0_i32, %c0_i32_0 : i32, i32
  }
  func.func @transform_5(%arg0: i32) -> (i32, i32) {
    %c0_i32 = arith.constant 0 : i32
    %c0_i32_0 = arith.constant 0 : i32
    %c0_i32_1 = arith.constant 0 : i32
    return %c0_i32, %c0_i32_0 : i32, i32
  }
  func.func @transform_6(%arg0: i32) -> (i32, i32) {
    %c0_i32 = arith.constant 0 : i32
    %c0_i32_0 = arith.constant 0 : i32
    %c0_i32_1 = arith.constant 0 : i32
    return %c0_i32, %c0_i32_0 : i32, i32
  }
  func.func @transform_7(%arg0: i32) -> (i32, i32) {
    %c0_i32 = arith.constant 0 : i32
    %c0_i32_0 = arith.constant 0 : i32
    return %c0_i32, %arg0 : i32, i32
  }
}

</mosaic_0001>

<bundles_post_ra>
// kernel: annnet_forward.1
= control target key start
LH: loop header
LB: loop body
LE: loop exit
PB: predicated region body
PF: predicated region fallthrough
CT: control target
= control target key end

     0   :  { %12 = vsyncpa [#allocation3], 0  ;;  %s744_s0 = inlined_call_operand.vmem [shape: f32[32,256], index: 0, kind: input, shape index: {}]   ;;  %s745_s1 = inlined_call_operand.vmem [shape: f32[32,32], index: 1, kind: input, shape index: {}]   ;;  %s746_s2 = inlined_call_operand.vmem [shape: f32[32,1], index: 2, kind: input, shape index: {}]   ;;  %s747_s3 = inlined_call_operand.hbm [shape: f32[32,32], index: 3, kind: input, shape index: {}]   ;;  %s748_s4 = inlined_call_operand.vmem [shape: f32[32,1], index: 4, kind: input, shape index: {}]   ;;  %s749_s5 = inlined_call_operand.hbm [shape: f32[32,32], index: 5, kind: input, shape index: {}]   ;;  %s750_s6 = inlined_call_operand.vmem [shape: f32[32,1], index: 6, kind: input, shape index: {}]   ;;  %s751_s7 = inlined_call_operand.hbm [shape: f32[32,256], index: 7, kind: output, shape index: {}]  }
   0x1   :  { %13 = vsyncpa [#allocation6], 0 }
   0x2   :  { %14 = vsyncpa [#allocation4], 0  ;;  %s590_s24 = smov [#allocation2]  }
   0x3   :  { %s26_s25 = sshll.u32 %s590_s24, 4  ;;  %s27_s25 = int_to_ptr.vmem [resolvable:$true] %s26_s25 }
   0x4   :  { %s532_s26 = scalar_lea.vmem %s27_s25, 512  ;;  %p537_p1 = scmp.lt.s32.totalorder %s27_s25, %s27_s25 }
   0x5   :  { %p533_p0 = scmp.ne.s32.totalorder %s27_s25, %s532_s26  ;;  %p538_p2 = scmp.lt.s32.totalorder %s532_s26, %s532_s26 }
   0x7   :  { %p539_p3 = por %p538_p2, %p537_p1 }
   0x9   :  { %p540_p4 = pnand %p539_p3, %p533_p0 }
   0xb   :  { %543 = shalt.err (!%p540_p4)
}
   0xc   :  { %s591_s27 = smov 128   ;;  %s592_s28 = smov 8  }
   0xd   :  { %32 = dma.hbm_to_vmem [thread:$0]  %s747_s3, 512, %s27_s25, [#allocation3], %s591_s27, %s591_s27, %s592_s28  }
   0xe   :  { %s593_s8 = smov [#allocation5]  }
   0xf   :  { %s40_s9 = sshll.u32 %s593_s8, 4  ;;  %s41_s9 = int_to_ptr.vmem [resolvable:$true] %s40_s9 }
  0x10   :  { %s552_s10 = scalar_lea.vmem %s41_s9, 512  ;;  %p557_p6 = scmp.lt.s32.totalorder %s41_s9, %s41_s9 }
  0x11   :  { %p553_p5 = scmp.ne.s32.totalorder %s41_s9, %s552_s10  ;;  %p558_p7 = scmp.lt.s32.totalorder %s552_s10, %s552_s10 }
  0x13   :  { %p559_p8 = por %p558_p7, %p557_p6 }
  0x15   :  { %p560_p9 = pnand %p559_p8, %p553_p5 }
  0x17   :  { %563 = shalt.err (!%p560_p9)
}
  0x18   :  { %46 = dma.hbm_to_vmem [thread:$0]  %s749_s5, 512, %s41_s9, [#allocation6], %s591_s27, %s591_s27, %s592_s28  }
  0x19   :  { %584 = dma.done.wait [#allocation3], 512  }
  0x1a   :  { %585 = vsyncadd [#allocation3], 4294966784 }
  0x1b   :  { %586 = dma.done.wait [#allocation6], 512  }
  0x1c   :  { %587 = vsyncadd [#allocation6], 4294966784  ;;  %v594_v0 = vmov 0.0   ;;  %v595_v1 = vmov 0   ;;  %v62_v2 = vld [vmem:[%s744_s0 + $0x38] sm:$0xff]  ;;  %v61_v3 = vld [vmem:[%s744_s0 + $0x30] sm:$0xff] }
  0x1d   :  { %180 = vmatprep.mubr.f32.mxu1 %v594_v0  ;;  %168 = vmatprep.mubr.f32.mxu0 %v594_v0  ;;  %v60_v4 = vld [vmem:[%s744_s0 + $0x28] sm:$0xff]  ;;  %v59_v5 = vld [vmem:[%s744_s0 + $0x20] sm:$0xff]  ;;  %v58_v6 = vld [vmem:[%s744_s0 + $0x18] sm:$0xff]  ;;  %vm91_vm0 = vcmask 261120  }
  0x1e   :  { %522 = vset.pattern.permute.xlu0 %v595_v1  ;;  %523 = vset.pattern.permute.xlu1 %v595_v1  ;;  %v57_v7 = vld [vmem:[%s744_s0 + $0x10] sm:$0xff]  ;;  %v56_v8 = vld [vmem:[%s744_s0 + $0x8] sm:$0xff]  ;;  %v55_v9 = vld [vmem:[%s744_s0] sm:$0xff] }
  0x1f   :  { %505 = vmatprep.subr.mxu1 %v62_v2  ;;  %128 = vmatprep.subr.mxu0 %v62_v2  ;;  %v65_v10 = vld [vmem:[%s745_s1 + $0x10] sm:$0xff]  ;;  %v63_v11 = vld [vmem:[%s745_s1] sm:$0xff]  ;;  %v70_v12 = vld [vmem:[%s746_s2 + $0x18] sm:$0xff] }
  0x20   :  { %509 = vmatpush1.msra.mxu1 %v61_v3  ;;  %129 = vmatpush1.msra.mxu0 %v61_v3  ;;  %v68_v13 = vld [vmem:[%s746_s2 + $0x8] sm:$0xff]  ;;  %v66_v14 = vld [vmem:[%s745_s1 + $0x18] sm:$0xff]  ;;  %v69_v16 = vld [vmem:[%s746_s2 + $0x10] sm:$0xff] }
  0x21   :  { %506 = vmatprep.subr.mxu1 %v60_v4  ;;  %130 = vmatprep.subr.mxu0 %v60_v4  ;;  %v64_v15 = vld [vmem:[%s745_s1 + $0x8] sm:$0xff]  ;;  %v67_v17 = vld [vmem:[%s746_s2] sm:$0xff]  ;;  %v208_v18 = vld [vmem:[%s748_s4 + $0x18] sm:$0xff] }
  0x22   :  { %510 = vmatpush1.msra.mxu1 %v59_v5  ;;  %131 = vmatpush1.msra.mxu0 %v59_v5  ;;  %v207_v19 = vld [vmem:[%s748_s4 + $0x10] sm:$0xff]  ;;  %v206_v20 = vld [vmem:[%s748_s4 + $0x8] sm:$0xff]  ;;  %v205_v21 = vld [vmem:[%s748_s4] sm:$0xff]  ;;  %s596_s4 = smov [#allocation7]  }
  0x23   :  { %507 = vmatprep.subr.mxu1 %v58_v6  ;;  %132 = vmatprep.subr.mxu0 %v58_v6  ;;  %v342_v22 = vld [vmem:[%s750_s6] sm:$0xff]  ;;  %v343_v23 = vld [vmem:[%s750_s6 + $0x8] sm:$0xff]  ;;  %v344_v24 = vld [vmem:[%s750_s6 + $0x10] sm:$0xff] }
  0x24   :  { %511 = vmatpush1.msra.mxu1 %v57_v7  ;;  %133 = vmatpush1.msra.mxu0 %v57_v7  ;;  %v345_v25 = vld [vmem:[%s750_s6 + $0x18] sm:$0xff]  ;;  %v201_v54 = vld [vmem:[#allocation2] sm:$0xff]  ;;  %v202_v55 = vld [vmem:[#allocation2 + $0x8] sm:$0xff]  ;;  %s480_s6 = sshll.u32 %s596_s4, 4  ;;  %s481_s6 = int_to_ptr.vmem [resolvable:$true] %s480_s6 }
  0x25   :  { %508 = vmatprep.subr.mxu1 %v56_v8  ;;  %134 = vmatprep.subr.mxu0 %v56_v8  ;;  %v203_v56 = vld [vmem:[#allocation2 + $0x10] sm:$0xff]  ;;  %v204_v57 = vld [vmem:[#allocation2 + $0x18] sm:$0xff]  ;;  %s564_s8 = scalar_lea.vmem %s481_s6, 1024  ;;  %p569_p11 = scmp.lt.s32.totalorder %s481_s6, %s481_s6 }
  0x26   :  { %512 = vmatpush1.msra.mxu1 %v55_v9  ;;  %135 = vmatpush1.msra.mxu0 %v55_v9  ;;  %p565_p10 = scmp.ne.s32.totalorder %s481_s6, %s564_s8  ;;  %p570_p12 = scmp.lt.s32.totalorder %s564_s8, %s564_s8 }
  0x27   :  { %495 = vmatmul.mubr.msk.f32.vlgmr.msra.gmra.mxu1 %vm91_vm0, %v65_v10  ;;  %493 = vmatmul.mubr.msk.f32.vlgmr.msra.gmra.mxu0 %vm91_vm0, %v63_v11 }
  0x28   :  { %186 = vmatprep.mubr.f32.mxu1 %v594_v0  ;;  %174 = vmatprep.mubr.f32.mxu0 %v594_v0  ;;  %p571_p13 = por %p570_p12, %p569_p11 }
  0x29   :  { %88 = vperm.xlu0 %522, %v70_v12   ;;  %78 = vperm.xlu1 %523, %v68_v13  }
  0x2a   :  { %p572_p0 = pnand %p571_p13, %p565_p10 }
  0x2b   :  { %496 = vmatmul.mubr.msk.f32.gmra.mxu1 %vm91_vm0, %v66_v14  ;;  %494 = vmatmul.mubr.msk.f32.gmra.mxu0 %vm91_vm0, %v64_v15 }
  0x2c   :  { %305 = vmatprep.mubr.f32.mxu1 %v594_v0  ;;  %442 = vmatprep.mubr.f32.mxu0 %v594_v0 }
  0x2d   :  { %83 = vperm.xlu0 %522, %v69_v16   ;;  %73 = vperm.xlu1 %523, %v67_v17  }
  0x31   :  { %226 = vperm.xlu0 %522, %v208_v18   ;;  %221 = vperm.xlu1 %523, %v207_v19  }
  0x35   :  { %216 = vperm.xlu0 %522, %v206_v20   ;;  %211 = vperm.xlu1 %523, %v205_v21  }
  0x39   :  { %348 = vperm.xlu0 %522, %v342_v22   ;;  %353 = vperm.xlu1 %523, %v343_v23   ;;  %v338_v23 = vld [vmem:[#allocation5] sm:$0xff] }
  0x3d   :  { %358 = vperm.xlu0 %522, %v344_v24   ;;  %363 = vperm.xlu1 %523, %v345_v25   ;;  %v339_v24 = vld [vmem:[#allocation5 + $0x8] sm:$0xff]  ;;  %v340_v25 = vld [vmem:[#allocation5 + $0x10] sm:$0xff] }
  0xa4   :  { %v89_v26 = vpop.permute.xlu0 %88  ;;  %v79_v31 = vpop.permute.xlu1 %78 }
  0xa8   :  { %v84_v34 = vpop.permute.xlu0 %83  ;;  %v74_v43 = vpop.permute.xlu1 %73 }
  0xac   :  { %v227_v63 = vpop.permute.xlu0 %226  ;;  %v222_v2 = vpop.permute.xlu1 %221 }
  0xb0   :  { %v217_v8 = vpop.permute.xlu0 %216  ;;  %v212_v12 = vpop.permute.xlu1 %211 }
  0xe7   :  { %v182_v27 = vpop.f32.mrf.mxu1  ;;  %v170_v28 = vpop.f32.mrf.mxu0 }
  0xe8   :  { %v183_v40 = vadd.f32 %v182_v27, %v84_v34  ;;  %v171_v49 = vadd.f32 %v170_v28, %v74_v43  ;;  %v349_v27 = vpop.permute.xlu0 %348 }
  0xe9   :  { %v184_v29 = vpop.f32.mrf.mxu1  ;;  %v172_v30 = vpop.f32.mrf.mxu0 }
  0xea   :  { %v185_v38 = vadd.f32 %v184_v29, %v84_v34  ;;  %v173_v47 = vadd.f32 %v172_v30, %v74_v43  ;;  %v197_v48 = vmax.f32 %v183_v40, 0.0  ;;  %v193_v53 = vmax.f32 %v171_v49, 0.0 }
  0xeb   :  { %v188_v32 = vpop.f32.mrf.mxu1  ;;  %v176_v33 = vpop.f32.mrf.mxu0 }
  0xec   :  { %v189_v35 = vadd.f32 %v188_v32, %v89_v26  ;;  %v177_v45 = vadd.f32 %v176_v33, %v79_v31  ;;  %v198_v46 = vmax.f32 %v185_v38, 0.0  ;;  %v194_v52 = vmax.f32 %v173_v47, 0.0  ;;  %v354_v32 = vpop.permute.xlu1 %353 }
  0xed   :  { %v190_v36 = vpop.f32.mrf.mxu1  ;;  %v178_v37 = vpop.f32.mrf.mxu0 }
  0xee   :  { %v191_v39 = vadd.f32 %v190_v36, %v89_v26  ;;  %v179_v42 = vadd.f32 %v178_v37, %v79_v31  ;;  %v199_v44 = vmax.f32 %v189_v35, 0.0  ;;  %v195_v51 = vmax.f32 %v177_v45, 0.0  ;;  %v341_v26 = vld [vmem:[#allocation5 + $0x18] sm:$0xff]  ;;  %v359_v37 = vpop.permute.xlu0 %358 }
  0xf0   :  { %v200_v41 = vmax.f32 %v191_v39, 0.0  ;;  %v196_v50 = vmax.f32 %v179_v42, 0.0 }
  0xf2   :  { %265 = vmatprep.subr.mxu1 %v200_v41  ;;  %v364_v41 = vpop.permute.xlu1 %363 }
  0xf3   :  { %266 = vmatpush1.msra.mxu1 %v199_v44 }
  0xf4   :  { %267 = vmatprep.subr.mxu1 %v198_v46 }
  0xf5   :  { %268 = vmatpush1.msra.mxu1 %v197_v48 }
  0xf6   :  { %269 = vmatprep.subr.mxu1 %v196_v50 }
  0xf7   :  { %270 = vmatpush1.msra.mxu1 %v195_v51 }
  0xf8   :  { %271 = vmatprep.subr.mxu1 %v194_v52 }
  0xf9   :  { %272 = vmatpush1.msra.mxu1 %v193_v53 }
  0xfa   :  { %497 = vmatmul.mubr.msk.f32.vlgmr.msra.gmra.mxu1 %vm91_vm0, %v201_v54 }
  0xfb   :  { %311 = vmatprep.mubr.f32.mxu1 %v594_v0 }
  0xfe   :  { %498 = vmatmul.mubr.msk.f32.gmra.mxu1 %vm91_vm0, %v202_v55 }
  0xff   :  { %317 = vmatprep.mubr.f32.mxu1 %v594_v0 }
 0x102   :  { %499 = vmatmul.mubr.msk.f32.gmra.mxu1 %vm91_vm0, %v203_v56 }
 0x103   :  { %323 = vmatprep.mubr.f32.mxu1 %v594_v0 }
 0x106   :  { %500 = vmatmul.mubr.msk.f32.gmra.mxu1 %vm91_vm0, %v204_v57 }
 0x1ba   :  { %v307_v58 = vpop.f32.mrf.mxu1 }
 0x1bb   :  { %v308_v17 = vadd.f32 %v307_v58, %v212_v12 }
 0x1bc   :  { %v309_v59 = vpop.f32.mrf.mxu1 }
 0x1bd   :  { %v310_v15 = vadd.f32 %v309_v59, %v212_v12  ;;  %v330_v22 = vmax.f32 %v308_v17, 0.0 }
 0x1be   :  { %v313_v60 = vpop.f32.mrf.mxu1 }
 0x1bf   :  { %v314_v13 = vadd.f32 %v313_v60, %v217_v8  ;;  %v331_v21 = vmax.f32 %v310_v15, 0.0 }
 0x1c0   :  { %v315_v61 = vpop.f32.mrf.mxu1 }
 0x1c1   :  { %v316_v10 = vadd.f32 %v315_v61, %v217_v8  ;;  %v332_v20 = vmax.f32 %v314_v13, 0.0 }
 0x1c2   :  { %v319_v62 = vpop.f32.mrf.mxu1 }
 0x1c3   :  { %v320_v9 = vadd.f32 %v319_v62, %v222_v2  ;;  %v333_v19 = vmax.f32 %v316_v10, 0.0 }
 0x1c4   :  { %v321_v1 = vpop.f32.mrf.mxu1 }
 0x1c5   :  { %v322_v6 = vadd.f32 %v321_v1, %v222_v2  ;;  %v334_v18 = vmax.f32 %v320_v9, 0.0 }
 0x1c6   :  { %v325_v3 = vpop.f32.mrf.mxu1 }
 0x1c7   :  { %v326_v4 = vadd.f32 %v325_v3, %v227_v63  ;;  %v335_v16 = vmax.f32 %v322_v6, 0.0 }
 0x1c8   :  { %v327_v5 = vpop.f32.mrf.mxu1 }
 0x1c9   :  { %v328_v7 = vadd.f32 %v327_v5, %v227_v63  ;;  %v336_v14 = vmax.f32 %v326_v4, 0.0 }
 0x1cb   :  { %v337_v11 = vmax.f32 %v328_v7, 0.0 }
 0x1cd   :  { %402 = vmatprep.subr.mxu0 %v337_v11 }
 0x1ce   :  { %403 = vmatpush1.msra.mxu0 %v336_v14 }
 0x1cf   :  { %404 = vmatprep.subr.mxu0 %v335_v16 }
 0x1d0   :  { %405 = vmatpush1.msra.mxu0 %v334_v18 }
 0x1d1   :  { %406 = vmatprep.subr.mxu0 %v333_v19 }
 0x1d2   :  { %407 = vmatpush1.msra.mxu0 %v332_v20 }
 0x1d3   :  { %408 = vmatprep.subr.mxu0 %v331_v21 }
 0x1d4   :  { %409 = vmatpush1.msra.mxu0 %v330_v22 }
 0x1d5   :  { %501 = vmatmul.mubr.msk.f32.vlgmr.msra.gmra.mxu0 %vm91_vm0, %v338_v23 }
 0x1d6   :  { %448 = vmatprep.mubr.f32.mxu0 %v594_v0 }
 0x1d9   :  { %502 = vmatmul.mubr.msk.f32.gmra.mxu0 %vm91_vm0, %v339_v24 }
 0x1da   :  { %454 = vmatprep.mubr.f32.mxu0 %v594_v0 }
 0x1dd   :  { %503 = vmatmul.mubr.msk.f32.gmra.mxu0 %vm91_vm0, %v340_v25 }
 0x1de   :  { %460 = vmatprep.mubr.f32.mxu0 %v594_v0 }
 0x1e1   :  { %504 = vmatmul.mubr.msk.f32.gmra.mxu0 %vm91_vm0, %v341_v26 }
 0x295   :  { %v444_v28 = vpop.f32.mrf.mxu0 }
 0x296   :  { %v445_v29 = vadd.f32 %v444_v28, %v349_v27 }
 0x297   :  { %v446_v30 = vpop.f32.mrf.mxu0 }
 0x298   :  { %467 = vst [vmem:[#allocation7] sm:$0xff] %v445_v29  ;;  %v447_v31 = vadd.f32 %v446_v30, %v349_v27 }
 0x299   :  { %v450_v33 = vpop.f32.mrf.mxu0 }
 0x29a   :  { %468 = vst [vmem:[#allocation7 + $0x8] sm:$0xff] %v447_v31  ;;  %v451_v34 = vadd.f32 %v450_v33, %v354_v32 }
 0x29b   :  { %v452_v35 = vpop.f32.mrf.mxu0 }
 0x29c   :  { %469 = vst [vmem:[#allocation7 + $0x10] sm:$0xff] %v451_v34  ;;  %v453_v36 = vadd.f32 %v452_v35, %v354_v32 }
 0x29d   :  { %v456_v38 = vpop.f32.mrf.mxu0 }
 0x29e   :  { %470 = vst [vmem:[#allocation7 + $0x18] sm:$0xff] %v453_v36  ;;  %v457_v0 = vadd.f32 %v456_v38, %v359_v37 }
 0x29f   :  { %v458_v39 = vpop.f32.mrf.mxu0 }
 0x2a0   :  { %471 = vst [vmem:[#allocation7 + $0x20] sm:$0xff] %v457_v0  ;;  %v459_v40 = vadd.f32 %v458_v39, %v359_v37 }
 0x2a1   :  { %v462_v42 = vpop.f32.mrf.mxu0 }
 0x2a2   :  { %472 = vst [vmem:[#allocation7 + $0x28] sm:$0xff] %v459_v40  ;;  %v463_v43 = vadd.f32 %v462_v42, %v364_v41 }
 0x2a3   :  { %v464_v44 = vpop.f32.mrf.mxu0 }
 0x2a4   :  { %473 = vst [vmem:[#allocation7 + $0x30] sm:$0xff] %v463_v43  ;;  %v465_v45 = vadd.f32 %v464_v44, %v364_v41 }
 0x2a6   :  { %474 = vst [vmem:[#allocation7 + $0x38] sm:$0xff] %v465_v45 }
 0x2a7   :  { %575 = shalt.err (!%p572_p0)
}
 0x2a8   :  { %s597_s9 = smov 256   ;;  %s598_s0 = smov 16  }
 0x2a9   :  { %486 = dma.vmem_to_hbm [thread:$0]  %s481_s6, 1024, %s751_s7, [#allocation4], %s597_s9, %s597_s9, %s598_s0  }
 0x2aa   :  { %588 = dma.done.wait [#allocation4], 1024  }
 0x2ab   :  { %589 = vsyncadd [#allocation4], 4294966272 }
 0x2ac   :  { %490 = vsyncpa [#allocation3], 1 }
 0x2ad   :  { %491 = vsyncpa [#allocation6], 1 }
 0x2ae   :  { %492 = vsyncpa [#allocation4], 1 }

</bundles_post_ra>
